<compile_context>
chip_gen: v6e
topology: v6e:2x2x1
jax: 0.10.0
libtpu: 0.0.40
codegen_flags: <defaults>
</compile_context>

<pallas_src>
import functools

import jax
import jax.numpy as jnp
from jax.experimental import pallas as pl
from jax.experimental.pallas import tpu as pltpu

NUM_ITERATIONS = 3
_LANE = 128
_MIB = 1024 * 1024


# ----------------------------------------------------------------------------
# Tiling / VMEM heuristics
# ----------------------------------------------------------------------------
def _round_up(x, m):
    return ((x + m - 1) // m) * m


def _sublanes(itemsize):
    # Mosaic VMEM tiles: (8,128) f32, (16,128) bf16, (32,128) int8/fp8.
    return {4: 8, 2: 16, 1: 32}.get(itemsize, 8)


def _tpu_generation():
    """Best-effort TPU generation (4/5/6/7); 0 if unknown."""
    try:
        kind = jax.devices()[0].device_kind.lower()
    except Exception:
        return 0
    for gen in (7, 6, 5, 4):
        if f"v{gen}" in kind or kind.startswith(f"tpu{gen}"):
            return gen
    return 0


def _vmem_limit_bytes(gen):
    if gen >= 7:
        return 32 * _MIB   # v7x: 64 MiB physical VMEM -> keep scoped limit at 32 MiB
    if gen == 6:
        return 64 * _MIB   # v6e: 128 MiB physical -> bigger tiles, fewer grid steps
    return 32 * _MIB       # v5e & unknown: above v5e's 16 MiB scoped default


def _padded_tile_bytes(tb, R, CD, itemsize):
    """Bytes of a (tb, R, CD) VMEM tile after (sublane, 128-lane) padding."""
    return tb * _round_up(max(R, 1), _sublanes(itemsize)) * _round_up(CD, _LANE) * itemsize


def _working_set_bytes(tb, R, CD, in_itemsize, cmp_itemsize):
    in_tile = _padded_tile_bytes(tb, R, CD, in_itemsize)
    cmp_tile = _padded_tile_bytes(tb, R, CD, cmp_itemsize)
    f32_tile = _padded_tile_bytes(tb, R, CD, 4)
    # 2x input (double-buffered DMA)  +  ~2 compute-dtype full-tile temporaries
    # (coupling*u, u*v)  +  ~3 f32 full-tile values (logits, f32 accumulation
    # of the R-sum, upcast / spill slack).
    return 2 * in_tile + 2 * cmp_tile + 3 * f32_tile


def _choose_batch_tile(B, R, CD, in_itemsize, cmp_itemsize, vmem_limit, gen):
    """Largest divisor of B whose padded working set fits the VMEM budget."""
    budget = int(0.7 * vmem_limit)
    best = 1
    for tb in range(1, B + 1):
        if B % tb == 0 and _working_set_bytes(tb, R, CD, in_itemsize, cmp_itemsize) <= budget:
            best = tb
    # v7x: two TensorCores share the ("parallel",) grid axis; keep the grid
    # length even so neither core idles.
    if gen >= 7 and (B // best) % 2 == 1 and best % 2 == 0:
        best //= 2
    return best


# ----------------------------------------------------------------------------
# Kernel
# ----------------------------------------------------------------------------
def _sigmoid_routing_kernel(u_ref, o_ref, *, num_capsules, out_dim,
                            compute_dtype, num_iterations):
    C, D = num_capsules, out_dim
    tb, R, CD = u_ref.shape
    f32 = jnp.float32

    u = u_ref[...]
    if u.dtype != compute_dtype:
        u = u.astype(compute_dtype)   # f32 upcast only on v5e/unknown (or f32 inputs)

    # Per-capsule 0/1 lane masks over the folded C*D axis (built once per step;
    # comparisons only -- no integer division in the vector unit).
    lane = jax.lax.broadcasted_iota(jnp.int32, (1, CD), 1)          # (1, CD)
    masks2 = [((lane >= c * D) & (lane < (c + 1) * D)).astype(f32) for c in range(C)]
    masks3 = [m[None, :, :] for m in masks2]                        # (1, 1, CD)

    def squash(s):
        # s: (tb, CD) f32.  Per-capsule ||s||^2/(1+||s||^2) * s/(||s||+1e-8),
        # with the per-capsule norm broadcast back onto that capsule's D lanes.
        ss = s * s
        sq = masks2[0] * jnp.sum(ss[:, 0:D], axis=-1, keepdims=True)
        for c in range(1, C):
            sq = sq + masks2[c] * jnp.sum(ss[:, c * D:(c + 1) * D], axis=-1, keepdims=True)
        norm = jnp.sqrt(sq)                                          # EUP
        scale = sq * pl.reciprocal((1.0 + sq) * (norm + 1e-8), approx=False)
        return s * scale                                             # (tb, CD) f32

    # Iteration 0: logits == 0  =>  coupling == sigmoid(0) == 0.5 exactly.
    s = 0.5 * jnp.sum(u, axis=1, dtype=f32)                          # (tb, CD)
    v = squash(s)

    # Remaining iterations: fused sweep -- agreement(v_prev) -> logits update ->
    # sigmoid -> coupling-weighted sum over the R route nodes.
    logits = None                                                    # (tb, R, CD) f32
    for it in range(1, num_iterations):
        uv = u * v.astype(compute_dtype)[:, None, :]                 # (tb, R, CD) lane-dense
        agreement = masks3[0] * jnp.sum(uv[:, :, 0:D], axis=-1, keepdims=True, dtype=f32)
        for c in range(1, C):
            agreement = agreement + masks3[c] * jnp.sum(
                uv[:, :, c * D:(c + 1) * D], axis=-1, keepdims=True, dtype=f32)
        logits = agreement if logits is None else logits + agreement  # f32

        coupling = jax.nn.sigmoid(logits)                             # (tb, R, CD) f32, EUP
        w = coupling.astype(compute_dtype) * u                        # lane-dense VPU
        s = jnp.sum(w, axis=1, dtype=f32)                             # f32 accumulation over R
        v = squash(s)

    o_ref[...] = v.astype(o_ref.dtype)[None]                          # (1, tb, CD)


# ----------------------------------------------------------------------------
# Wrapper
# ----------------------------------------------------------------------------
@functools.partial(jax.jit, static_argnames=("num_iterations",))
def sigmoid_routing(u_hat, num_iterations=NUM_ITERATIONS):
    """u_hat: (B, R, C, D) -> (B, C, D), matching SigmoidRouting.forward."""
    B, R, C, D = u_hat.shape
    CD = C * D
    gen = _tpu_generation()

    compute_dtype = jnp.float32
    if u_hat.dtype == jnp.bfloat16 and gen >= 6:
        # v6e/v7x: native bf16 VALUs -> keep u in bf16 for the two full-tile
        # multiplies; all reductions still accumulate in f32.
        compute_dtype = jnp.bfloat16

    vmem_limit = _vmem_limit_bytes(gen)
    in_isize = u_hat.dtype.itemsize
    cmp_isize = jnp.dtype(compute_dtype).itemsize
    tb = _choose_batch_tile(B, R, CD, in_isize, cmp_isize, vmem_limit, gen)
    nb = B // tb

    ws = _working_set_bytes(tb, R, CD, in_isize, cmp_isize)
    if ws > int(0.7 * vmem_limit):
        # Even a single-batch tile needs more scoped VMEM than the default:
        # raise the limit, bounded by the smallest chip's physical VMEM.
        phys_cap = 56 * _MIB if gen >= 7 else 100 * _MIB
        vmem_limit = min(phys_cap, int(ws / 0.7) + _MIB)

    kernel = functools.partial(
        _sigmoid_routing_kernel,
        num_capsules=C, out_dim=D,
        compute_dtype=compute_dtype, num_iterations=num_iterations)

    out = pl.pallas_call(
        kernel,
        out_shape=jax.ShapeDtypeStruct((nb, tb, CD), u_hat.dtype),
        grid_spec=pltpu.PrefetchScalarGridSpec(
            num_scalar_prefetch=0,
            grid=(nb,),
            # Last two dims of every block equal the full array dims, so the
            # (8,128) block-shape rule holds for any (R, C, D).
            in_specs=[pl.BlockSpec((tb, R, CD), lambda b: (b, 0, 0))],
            out_specs=pl.BlockSpec((1, tb, CD), lambda b: (b, 0, 0)),
        ),
        compiler_params=pltpu.CompilerParams(
            dimension_semantics=("parallel",),
            vmem_limit_bytes=vmem_limit,
        ),
    )(u_hat.reshape(B, R, CD))

    return out.reshape(B, C, D)


# ----------------------------------------------------------------------------
# Pure-JAX reference (mirrors the PyTorch module)
# ----------------------------------------------------------------------------
def sigmoid_routing_ref(u_hat, num_iterations=NUM_ITERATIONS):
    u = u_hat.astype(jnp.float32)
    B, R, C, D = u.shape
    logits = jnp.zeros((B, R, C, 1), dtype=jnp.float32)
    v_j = None
    for it in range(num_iterations):
        cc = jax.nn.sigmoid(logits)
        s_j = jnp.sum(cc * u, axis=1, keepdims=True)                  # (B,1,C,D)
        norm = jnp.sqrt(jnp.sum(s_j * s_j, axis=-1, keepdims=True))
        v_j = (norm ** 2) / (1 + norm ** 2) * (s_j / (norm + 1e-8))
        if it < num_iterations - 1:
            agreement = jnp.sum(u * v_j, axis=-1, keepdims=True)
            logits = logits + agreement
    return jnp.squeeze(v_j, axis=1).astype(u_hat.dtype)


if __name__ == "__main__":
    # (batch, num_route_nodes, num_capsules, out_dim)
    B, R, C, D = 2, 8, 4, 16
    key = jax.random.PRNGKey(0)
    u_hat = jax.random.normal(key, (B, R, C, D), dtype=jnp.float32)

    out = jax.block_until_ready(sigmoid_routing(u_hat))
    ref = sigmoid_routing_ref(u_hat)
    assert out.shape == (B, C, D)
    assert jnp.allclose(out, ref, atol=1e-5, rtol=1e-5), "f32 mismatch vs reference"

    # bf16 input path: half the HBM traffic; reductions still accumulate in f32.
    u_bf16 = u_hat.astype(jnp.bfloat16)
    out_bf16 = jax.block_until_ready(sigmoid_routing(u_bf16))
    ref_bf16 = sigmoid_routing_ref(u_bf16)
    assert out_bf16.shape == (B, C, D)
    assert jnp.allclose(out_bf16.astype(jnp.float32), ref_bf16.astype(jnp.float32),
                        atol=2e-2, rtol=2e-2), "bf16 mismatch vs reference"

    print("KERNEL_OK")
</pallas_src>

<mosaic_0001>
module attributes {stable_mosaic.version = 11 : i64} {
  func.func @_sigmoid_routing_kernel(%arg0: i32, %arg1: memref<2x8x64xf32, #tpu.memory_space<vmem>>, %arg2: memref<1x2x64xf32, #tpu.memory_space<vmem>>) attributes {dimension_semantics = [#tpu.dimension_semantics<parallel>], iteration_bounds = array<i64: 1>, scalar_prefetch = 0 : i64, scratch_operands = 0 : i64, tpu.core_type = #tpu.core_type<tc>, window_params = [{transform_indices = @transform_0, window_bounds = array<i64: 2, 8, 64>}, {transform_indices = @transform_1, window_bounds = array<i64: 1, 2, 64>}]} {
    %c0 = arith.constant 0 : index
    %c0_0 = arith.constant 0 : index
    %c0_1 = arith.constant 0 : index
    %0 = vector.load %arg1[%c0, %c0_0, %c0_1] : memref<2x8x64xf32, #tpu.memory_space<vmem>>, vector<2x8x64xf32>
    %1 = tpu.iota {dimensions = array<i32: 1>} : vector<1x64xi32>
    %c0_i32 = arith.constant 0 : i32
    %2 = vector.broadcast %c0_i32 : i32 to vector<1x64xi32>
    %3 = arith.cmpi sge, %1, %2 : vector<1x64xi32>
    %c16_i32 = arith.constant 16 : i32
    %4 = vector.broadcast %c16_i32 : i32 to vector<1x64xi32>
    %5 = arith.cmpi slt, %1, %4 : vector<1x64xi32>
    %6 = arith.andi %3, %5 : vector<1x64xi1>
    %7 = arith.extui %6 : vector<1x64xi1> to vector<1x64xi32>
    %8 = arith.sitofp %7 : vector<1x64xi32> to vector<1x64xf32>
    %c16_i32_2 = arith.constant 16 : i32
    %9 = vector.broadcast %c16_i32_2 : i32 to vector<1x64xi32>
    %10 = arith.cmpi sge, %1, %9 : vector<1x64xi32>
    %c32_i32 = arith.constant 32 : i32
    %11 = vector.broadcast %c32_i32 : i32 to vector<1x64xi32>
    %12 = arith.cmpi slt, %1, %11 : vector<1x64xi32>
    %13 = arith.andi %10, %12 : vector<1x64xi1>
    %14 = arith.extui %13 : vector<1x64xi1> to vector<1x64xi32>
    %15 = arith.sitofp %14 : vector<1x64xi32> to vector<1x64xf32>
    %c32_i32_3 = arith.constant 32 : i32
    %16 = vector.broadcast %c32_i32_3 : i32 to vector<1x64xi32>
    %17 = arith.cmpi sge, %1, %16 : vector<1x64xi32>
    %c48_i32 = arith.constant 48 : i32
    %18 = vector.broadcast %c48_i32 : i32 to vector<1x64xi32>
    %19 = arith.cmpi slt, %1, %18 : vector<1x64xi32>
    %20 = arith.andi %17, %19 : vector<1x64xi1>
    %21 = arith.extui %20 : vector<1x64xi1> to vector<1x64xi32>
    %22 = arith.sitofp %21 : vector<1x64xi32> to vector<1x64xf32>
    %c48_i32_4 = arith.constant 48 : i32
    %23 = vector.broadcast %c48_i32_4 : i32 to vector<1x64xi32>
    %24 = arith.cmpi sge, %1, %23 : vector<1x64xi32>
    %c64_i32 = arith.constant 64 : i32
    %25 = vector.broadcast %c64_i32 : i32 to vector<1x64xi32>
    %26 = arith.cmpi slt, %1, %25 : vector<1x64xi32>
    %27 = arith.andi %24, %26 : vector<1x64xi1>
    %28 = arith.extui %27 : vector<1x64xi1> to vector<1x64xi32>
    %29 = arith.sitofp %28 : vector<1x64xi32> to vector<1x64xf32>
    %30 = vector.shape_cast %8 : vector<1x64xf32> to vector<1x1x64xf32>
    %31 = vector.shape_cast %15 : vector<1x64xf32> to vector<1x1x64xf32>
    %32 = vector.shape_cast %22 : vector<1x64xf32> to vector<1x1x64xf32>
    %33 = vector.shape_cast %29 : vector<1x64xf32> to vector<1x1x64xf32>
    %cst = arith.constant dense<0.000000e+00> : vector<2x64xf32>
    %34 = vector.multi_reduction <add>, %0, %cst [1] : vector<2x8x64xf32> to vector<2x64xf32>
    %cst_5 = arith.constant 5.000000e-01 : f32
    %35 = vector.broadcast %cst_5 : f32 to vector<2x64xf32>
    %36 = arith.mulf %35, %34 : vector<2x64xf32>
    %37 = arith.mulf %36, %36 : vector<2x64xf32>
    %38 = vector.extract_strided_slice %37 {offsets = [0, 0], sizes = [2, 16], strides = [1, 1]} : vector<2x64xf32> to vector<2x16xf32>
    %cst_6 = arith.constant dense<0.000000e+00> : vector<2xf32>
    %39 = vector.multi_reduction <add>, %38, %cst_6 [1] : vector<2x16xf32> to vector<2xf32>
    %40 = vector.shape_cast %39 : vector<2xf32> to vector<2x1xf32>
    %41 = vector.broadcast %8 : vector<1x64xf32> to vector<2x64xf32>
    %42 = vector.broadcast %40 : vector<2x1xf32> to vector<2x64xf32>
    %43 = arith.mulf %41, %42 : vector<2x64xf32>
    %44 = vector.extract_strided_slice %37 {offsets = [0, 16], sizes = [2, 16], strides = [1, 1]} : vector<2x64xf32> to vector<2x16xf32>
    %cst_7 = arith.constant dense<0.000000e+00> : vector<2xf32>
    %45 = vector.multi_reduction <add>, %44, %cst_7 [1] : vector<2x16xf32> to vector<2xf32>
    %46 = vector.shape_cast %45 : vector<2xf32> to vector<2x1xf32>
    %47 = vector.broadcast %15 : vector<1x64xf32> to vector<2x64xf32>
    %48 = vector.broadcast %46 : vector<2x1xf32> to vector<2x64xf32>
    %49 = arith.mulf %47, %48 : vector<2x64xf32>
    %50 = arith.addf %43, %49 : vector<2x64xf32>
    %51 = vector.extract_strided_slice %37 {offsets = [0, 32], sizes = [2, 16], strides = [1, 1]} : vector<2x64xf32> to vector<2x16xf32>
    %cst_8 = arith.constant dense<0.000000e+00> : vector<2xf32>
    %52 = vector.multi_reduction <add>, %51, %cst_8 [1] : vector<2x16xf32> to vector<2xf32>
    %53 = vector.shape_cast %52 : vector<2xf32> to vector<2x1xf32>
    %54 = vector.broadcast %22 : vector<1x64xf32> to vector<2x64xf32>
    %55 = vector.broadcast %53 : vector<2x1xf32> to vector<2x64xf32>
    %56 = arith.mulf %54, %55 : vector<2x64xf32>
    %57 = arith.addf %50, %56 : vector<2x64xf32>
    %58 = vector.extract_strided_slice %37 {offsets = [0, 48], sizes = [2, 16], strides = [1, 1]} : vector<2x64xf32> to vector<2x16xf32>
    %cst_9 = arith.constant dense<0.000000e+00> : vector<2xf32>
    %59 = vector.multi_reduction <add>, %58, %cst_9 [1] : vector<2x16xf32> to vector<2xf32>
    %60 = vector.shape_cast %59 : vector<2xf32> to vector<2x1xf32>
    %61 = vector.broadcast %29 : vector<1x64xf32> to vector<2x64xf32>
    %62 = vector.broadcast %60 : vector<2x1xf32> to vector<2x64xf32>
    %63 = arith.mulf %61, %62 : vector<2x64xf32>
    %64 = arith.addf %57, %63 : vector<2x64xf32>
    %65 = math.sqrt %64 : vector<2x64xf32>
    %cst_10 = arith.constant 1.000000e+00 : f32
    %66 = vector.broadcast %cst_10 : f32 to vector<2x64xf32>
    %67 = arith.addf %66, %64 : vector<2x64xf32>
    %cst_11 = arith.constant 9.99999993E-9 : f32
    %68 = vector.broadcast %cst_11 : f32 to vector<2x64xf32>
    %69 = arith.addf %65, %68 : vector<2x64xf32>
    %70 = arith.mulf %67, %69 : vector<2x64xf32>
    %71 = tpu.reciprocal %70 : vector<2x64xf32> -> vector<2x64xf32>
    %72 = arith.mulf %64, %71 : vector<2x64xf32>
    %73 = arith.mulf %36, %72 : vector<2x64xf32>
    %74 = vector.shape_cast %73 : vector<2x64xf32> to vector<2x1x64xf32>
    %75 = vector.broadcast %74 : vector<2x1x64xf32> to vector<2x8x64xf32>
    %76 = arith.mulf %0, %75 : vector<2x8x64xf32>
    %77 = vector.extract_strided_slice %76 {offsets = [0, 0, 0], sizes = [2, 8, 16], strides = [1, 1, 1]} : vector<2x8x64xf32> to vector<2x8x16xf32>
    %cst_12 = arith.constant dense<0.000000e+00> : vector<2x8xf32>
    %78 = vector.multi_reduction <add>, %77, %cst_12 [2] : vector<2x8x16xf32> to vector<2x8xf32>
    %79 = vector.shape_cast %78 : vector<2x8xf32> to vector<2x8x1xf32>
    %80 = vector.broadcast %30 : vector<1x1x64xf32> to vector<2x8x64xf32>
    %81 = vector.broadcast %79 : vector<2x8x1xf32> to vector<2x8x64xf32>
    %82 = arith.mulf %80, %81 : vector<2x8x64xf32>
    %83 = vector.extract_strided_slice %76 {offsets = [0, 0, 16], sizes = [2, 8, 16], strides = [1, 1, 1]} : vector<2x8x64xf32> to vector<2x8x16xf32>
    %cst_13 = arith.constant dense<0.000000e+00> : vector<2x8xf32>
    %84 = vector.multi_reduction <add>, %83, %cst_13 [2] : vector<2x8x16xf32> to vector<2x8xf32>
    %85 = vector.shape_cast %84 : vector<2x8xf32> to vector<2x8x1xf32>
    %86 = vector.broadcast %31 : vector<1x1x64xf32> to vector<2x8x64xf32>
    %87 = vector.broadcast %85 : vector<2x8x1xf32> to vector<2x8x64xf32>
    %88 = arith.mulf %86, %87 : vector<2x8x64xf32>
    %89 = arith.addf %82, %88 : vector<2x8x64xf32>
    %90 = vector.extract_strided_slice %76 {offsets = [0, 0, 32], sizes = [2, 8, 16], strides = [1, 1, 1]} : vector<2x8x64xf32> to vector<2x8x16xf32>
    %cst_14 = arith.constant dense<0.000000e+00> : vector<2x8xf32>
    %91 = vector.multi_reduction <add>, %90, %cst_14 [2] : vector<2x8x16xf32> to vector<2x8xf32>
    %92 = vector.shape_cast %91 : vector<2x8xf32> to vector<2x8x1xf32>
    %93 = vector.broadcast %32 : vector<1x1x64xf32> to vector<2x8x64xf32>
    %94 = vector.broadcast %92 : vector<2x8x1xf32> to vector<2x8x64xf32>
    %95 = arith.mulf %93, %94 : vector<2x8x64xf32>
    %96 = arith.addf %89, %95 : vector<2x8x64xf32>
    %97 = vector.extract_strided_slice %76 {offsets = [0, 0, 48], sizes = [2, 8, 16], strides = [1, 1, 1]} : vector<2x8x64xf32> to vector<2x8x16xf32>
    %cst_15 = arith.constant dense<0.000000e+00> : vector<2x8xf32>
    %98 = vector.multi_reduction <add>, %97, %cst_15 [2] : vector<2x8x16xf32> to vector<2x8xf32>
    %99 = vector.shape_cast %98 : vector<2x8xf32> to vector<2x8x1xf32>
    %100 = vector.broadcast %33 : vector<1x1x64xf32> to vector<2x8x64xf32>
    %101 = vector.broadcast %99 : vector<2x8x1xf32> to vector<2x8x64xf32>
    %102 = arith.mulf %100, %101 : vector<2x8x64xf32>
    %103 = arith.addf %96, %102 : vector<2x8x64xf32>
    %104 = arith.negf %103 : vector<2x8x64xf32>
    %105 = math.exp %104 : vector<2x8x64xf32>
    %cst_16 = arith.constant 1.000000e+00 : f32
    %106 = vector.broadcast %cst_16 : f32 to vector<2x8x64xf32>
    %107 = arith.addf %106, %105 : vector<2x8x64xf32>
    %108 = arith.divf %106, %107 : vector<2x8x64xf32>
    %109 = arith.mulf %108, %0 : vector<2x8x64xf32>
    %cst_17 = arith.constant dense<0.000000e+00> : vector<2x64xf32>
    %110 = vector.multi_reduction <add>, %109, %cst_17 [1] : vector<2x8x64xf32> to vector<2x64xf32>
    %111 = arith.mulf %110, %110 : vector<2x64xf32>
    %112 = vector.extract_strided_slice %111 {offsets = [0, 0], sizes = [2, 16], strides = [1, 1]} : vector<2x64xf32> to vector<2x16xf32>
    %cst_18 = arith.constant dense<0.000000e+00> : vector<2xf32>
    %113 = vector.multi_reduction <add>, %112, %cst_18 [1] : vector<2x16xf32> to vector<2xf32>
    %114 = vector.shape_cast %113 : vector<2xf32> to vector<2x1xf32>
    %115 = vector.broadcast %8 : vector<1x64xf32> to vector<2x64xf32>
    %116 = vector.broadcast %114 : vector<2x1xf32> to vector<2x64xf32>
    %117 = arith.mulf %115, %116 : vector<2x64xf32>
    %118 = vector.extract_strided_slice %111 {offsets = [0, 16], sizes = [2, 16], strides = [1, 1]} : vector<2x64xf32> to vector<2x16xf32>
    %cst_19 = arith.constant dense<0.000000e+00> : vector<2xf32>
    %119 = vector.multi_reduction <add>, %118, %cst_19 [1] : vector<2x16xf32> to vector<2xf32>
    %120 = vector.shape_cast %119 : vector<2xf32> to vector<2x1xf32>
    %121 = vector.broadcast %15 : vector<1x64xf32> to vector<2x64xf32>
    %122 = vector.broadcast %120 : vector<2x1xf32> to vector<2x64xf32>
    %123 = arith.mulf %121, %122 : vector<2x64xf32>
    %124 = arith.addf %117, %123 : vector<2x64xf32>
    %125 = vector.extract_strided_slice %111 {offsets = [0, 32], sizes = [2, 16], strides = [1, 1]} : vector<2x64xf32> to vector<2x16xf32>
    %cst_20 = arith.constant dense<0.000000e+00> : vector<2xf32>
    %126 = vector.multi_reduction <add>, %125, %cst_20 [1] : vector<2x16xf32> to vector<2xf32>
    %127 = vector.shape_cast %126 : vector<2xf32> to vector<2x1xf32>
    %128 = vector.broadcast %22 : vector<1x64xf32> to vector<2x64xf32>
    %129 = vector.broadcast %127 : vector<2x1xf32> to vector<2x64xf32>
    %130 = arith.mulf %128, %129 : vector<2x64xf32>
    %131 = arith.addf %124, %130 : vector<2x64xf32>
    %132 = vector.extract_strided_slice %111 {offsets = [0, 48], sizes = [2, 16], strides = [1, 1]} : vector<2x64xf32> to vector<2x16xf32>
    %cst_21 = arith.constant dense<0.000000e+00> : vector<2xf32>
    %133 = vector.multi_reduction <add>, %132, %cst_21 [1] : vector<2x16xf32> to vector<2xf32>
    %134 = vector.shape_cast %133 : vector<2xf32> to vector<2x1xf32>
    %135 = vector.broadcast %29 : vector<1x64xf32> to vector<2x64xf32>
    %136 = vector.broadcast %134 : vector<2x1xf32> to vector<2x64xf32>
    %137 = arith.mulf %135, %136 : vector<2x64xf32>
    %138 = arith.addf %131, %137 : vector<2x64xf32>
    %139 = math.sqrt %138 : vector<2x64xf32>
    %cst_22 = arith.constant 1.000000e+00 : f32
    %140 = vector.broadcast %cst_22 : f32 to vector<2x64xf32>
    %141 = arith.addf %140, %138 : vector<2x64xf32>
    %cst_23 = arith.constant 9.99999993E-9 : f32
    %142 = vector.broadcast %cst_23 : f32 to vector<2x64xf32>
    %143 = arith.addf %139, %142 : vector<2x64xf32>
    %144 = arith.mulf %141, %143 : vector<2x64xf32>
    %145 = tpu.reciprocal %144 : vector<2x64xf32> -> vector<2x64xf32>
    %146 = arith.mulf %138, %145 : vector<2x64xf32>
    %147 = arith.mulf %110, %146 : vector<2x64xf32>
    %148 = vector.shape_cast %147 : vector<2x64xf32> to vector<2x1x64xf32>
    %149 = vector.broadcast %148 : vector<2x1x64xf32> to vector<2x8x64xf32>
    %150 = arith.mulf %0, %149 : vector<2x8x64xf32>
    %151 = vector.extract_strided_slice %150 {offsets = [0, 0, 0], sizes = [2, 8, 16], strides = [1, 1, 1]} : vector<2x8x64xf32> to vector<2x8x16xf32>
    %cst_24 = arith.constant dense<0.000000e+00> : vector<2x8xf32>
    %152 = vector.multi_reduction <add>, %151, %cst_24 [2] : vector<2x8x16xf32> to vector<2x8xf32>
    %153 = vector.shape_cast %152 : vector<2x8xf32> to vector<2x8x1xf32>
    %154 = vector.broadcast %30 : vector<1x1x64xf32> to vector<2x8x64xf32>
    %155 = vector.broadcast %153 : vector<2x8x1xf32> to vector<2x8x64xf32>
    %156 = arith.mulf %154, %155 : vector<2x8x64xf32>
    %157 = vector.extract_strided_slice %150 {offsets = [0, 0, 16], sizes = [2, 8, 16], strides = [1, 1, 1]} : vector<2x8x64xf32> to vector<2x8x16xf32>
    %cst_25 = arith.constant dense<0.000000e+00> : vector<2x8xf32>
    %158 = vector.multi_reduction <add>, %157, %cst_25 [2] : vector<2x8x16xf32> to vector<2x8xf32>
    %159 = vector.shape_cast %158 : vector<2x8xf32> to vector<2x8x1xf32>
    %160 = vector.broadcast %31 : vector<1x1x64xf32> to vector<2x8x64xf32>
    %161 = vector.broadcast %159 : vector<2x8x1xf32> to vector<2x8x64xf32>
    %162 = arith.mulf %160, %161 : vector<2x8x64xf32>
    %163 = arith.addf %156, %162 : vector<2x8x64xf32>
    %164 = vector.extract_strided_slice %150 {offsets = [0, 0, 32], sizes = [2, 8, 16], strides = [1, 1, 1]} : vector<2x8x64xf32> to vector<2x8x16xf32>
    %cst_26 = arith.constant dense<0.000000e+00> : vector<2x8xf32>
    %165 = vector.multi_reduction <add>, %164, %cst_26 [2] : vector<2x8x16xf32> to vector<2x8xf32>
    %166 = vector.shape_cast %165 : vector<2x8xf32> to vector<2x8x1xf32>
    %167 = vector.broadcast %32 : vector<1x1x64xf32> to vector<2x8x64xf32>
    %168 = vector.broadcast %166 : vector<2x8x1xf32> to vector<2x8x64xf32>
    %169 = arith.mulf %167, %168 : vector<2x8x64xf32>
    %170 = arith.addf %163, %169 : vector<2x8x64xf32>
    %171 = vector.extract_strided_slice %150 {offsets = [0, 0, 48], sizes = [2, 8, 16], strides = [1, 1, 1]} : vector<2x8x64xf32> to vector<2x8x16xf32>
    %cst_27 = arith.constant dense<0.000000e+00> : vector<2x8xf32>
    %172 = vector.multi_reduction <add>, %171, %cst_27 [2] : vector<2x8x16xf32> to vector<2x8xf32>
    %173 = vector.shape_cast %172 : vector<2x8xf32> to vector<2x8x1xf32>
    %174 = vector.broadcast %33 : vector<1x1x64xf32> to vector<2x8x64xf32>
    %175 = vector.broadcast %173 : vector<2x8x1xf32> to vector<2x8x64xf32>
    %176 = arith.mulf %174, %175 : vector<2x8x64xf32>
    %177 = arith.addf %170, %176 : vector<2x8x64xf32>
    %178 = arith.addf %103, %177 : vector<2x8x64xf32>
    %179 = arith.negf %178 : vector<2x8x64xf32>
    %180 = math.exp %179 : vector<2x8x64xf32>
    %cst_28 = arith.constant 1.000000e+00 : f32
    %181 = vector.broadcast %cst_28 : f32 to vector<2x8x64xf32>
    %182 = arith.addf %181, %180 : vector<2x8x64xf32>
    %183 = arith.divf %181, %182 : vector<2x8x64xf32>
    %184 = arith.mulf %183, %0 : vector<2x8x64xf32>
    %cst_29 = arith.constant dense<0.000000e+00> : vector<2x64xf32>
    %185 = vector.multi_reduction <add>, %184, %cst_29 [1] : vector<2x8x64xf32> to vector<2x64xf32>
    %186 = arith.mulf %185, %185 : vector<2x64xf32>
    %187 = vector.extract_strided_slice %186 {offsets = [0, 0], sizes = [2, 16], strides = [1, 1]} : vector<2x64xf32> to vector<2x16xf32>
    %cst_30 = arith.constant dense<0.000000e+00> : vector<2xf32>
    %188 = vector.multi_reduction <add>, %187, %cst_30 [1] : vector<2x16xf32> to vector<2xf32>
    %189 = vector.shape_cast %188 : vector<2xf32> to vector<2x1xf32>
    %190 = vector.broadcast %8 : vector<1x64xf32> to vector<2x64xf32>
    %191 = vector.broadcast %189 : vector<2x1xf32> to vector<2x64xf32>
    %192 = arith.mulf %190, %191 : vector<2x64xf32>
    %193 = vector.extract_strided_slice %186 {offsets = [0, 16], sizes = [2, 16], strides = [1, 1]} : vector<2x64xf32> to vector<2x16xf32>
    %cst_31 = arith.constant dense<0.000000e+00> : vector<2xf32>
    %194 = vector.multi_reduction <add>, %193, %cst_31 [1] : vector<2x16xf32> to vector<2xf32>
    %195 = vector.shape_cast %194 : vector<2xf32> to vector<2x1xf32>
    %196 = vector.broadcast %15 : vector<1x64xf32> to vector<2x64xf32>
    %197 = vector.broadcast %195 : vector<2x1xf32> to vector<2x64xf32>
    %198 = arith.mulf %196, %197 : vector<2x64xf32>
    %199 = arith.addf %192, %198 : vector<2x64xf32>
    %200 = vector.extract_strided_slice %186 {offsets = [0, 32], sizes = [2, 16], strides = [1, 1]} : vector<2x64xf32> to vector<2x16xf32>
    %cst_32 = arith.constant dense<0.000000e+00> : vector<2xf32>
    %201 = vector.multi_reduction <add>, %200, %cst_32 [1] : vector<2x16xf32> to vector<2xf32>
    %202 = vector.shape_cast %201 : vector<2xf32> to vector<2x1xf32>
    %203 = vector.broadcast %22 : vector<1x64xf32> to vector<2x64xf32>
    %204 = vector.broadcast %202 : vector<2x1xf32> to vector<2x64xf32>
    %205 = arith.mulf %203, %204 : vector<2x64xf32>
    %206 = arith.addf %199, %205 : vector<2x64xf32>
    %207 = vector.extract_strided_slice %186 {offsets = [0, 48], sizes = [2, 16], strides = [1, 1]} : vector<2x64xf32> to vector<2x16xf32>
    %cst_33 = arith.constant dense<0.000000e+00> : vector<2xf32>
    %208 = vector.multi_reduction <add>, %207, %cst_33 [1] : vector<2x16xf32> to vector<2xf32>
    %209 = vector.shape_cast %208 : vector<2xf32> to vector<2x1xf32>
    %210 = vector.broadcast %29 : vector<1x64xf32> to vector<2x64xf32>
    %211 = vector.broadcast %209 : vector<2x1xf32> to vector<2x64xf32>
    %212 = arith.mulf %210, %211 : vector<2x64xf32>
    %213 = arith.addf %206, %212 : vector<2x64xf32>
    %214 = math.sqrt %213 : vector<2x64xf32>
    %cst_34 = arith.constant 1.000000e+00 : f32
    %215 = vector.broadcast %cst_34 : f32 to vector<2x64xf32>
    %216 = arith.addf %215, %213 : vector<2x64xf32>
    %cst_35 = arith.constant 9.99999993E-9 : f32
    %217 = vector.broadcast %cst_35 : f32 to vector<2x64xf32>
    %218 = arith.addf %214, %217 : vector<2x64xf32>
    %219 = arith.mulf %216, %218 : vector<2x64xf32>
    %220 = tpu.reciprocal %219 : vector<2x64xf32> -> vector<2x64xf32>
    %221 = arith.mulf %213, %220 : vector<2x64xf32>
    %222 = arith.mulf %185, %221 : vector<2x64xf32>
    %223 = vector.shape_cast %222 : vector<2x64xf32> to vector<1x2x64xf32>
    %c0_36 = arith.constant 0 : index
    %c0_37 = arith.constant 0 : index
    %c0_38 = arith.constant 0 : index
    %224 = vector.load %arg2[%c0_36, %c0_37, %c0_38] : memref<1x2x64xf32, #tpu.memory_space<vmem>>, vector<1x2x64xf32>
    tpu.vector_store %arg2[%c0_36, %c0_37, %c0_38], %223 {strides = array<i32>} : memref<1x2x64xf32, #tpu.memory_space<vmem>>, vector<1x2x64xf32>,
    return
  }
  func.func @transform_0(%arg0: i32) -> (i32, i32, i32) {
    %c0_i32 = arith.constant 0 : i32
    %c0_i32_0 = arith.constant 0 : i32
    %c0_i32_1 = arith.constant 0 : i32
    return %arg0, %c0_i32, %c0_i32_0 : i32, i32, i32
  }
  func.func @transform_1(%arg0: i32) -> (i32, i32, i32) {
    %c0_i32 = arith.constant 0 : i32
    %c0_i32_0 = arith.constant 0 : i32
    %c0_i32_1 = arith.constant 0 : i32
    return %arg0, %c0_i32, %c0_i32_0 : i32, i32, i32
  }
}

</mosaic_0001>

<bundles_post_ra>
// kernel: sigmoid_routing.1
= control target key start
LH: loop header
LB: loop body
LE: loop exit
PB: predicated region body
PF: predicated region fallthrough
CT: control target
= control target key end

     0   :  { %vm32_vm0 = vcmask 523264   ;;  %vm53_vm1 = vcmask 1041409   ;;  %s454_s10 = smov 80   ;;  %s455_s11 = smov 96   ;;  %vm56_vm2 = vcmask 123904   ;;  %v10_v28 = vlaneseq  ;;  %s609_s0 = inlined_call_operand.vmem [shape: f32[2,8,64], index: 0, kind: input, shape index: {}]   ;;  %s610_s1 = inlined_call_operand.vmem [shape: f32[1,2,64], index: 1, kind: output, shape index: {}]  }
   0x1   :  { %v470_v0 = vld [vmem:[%s609_s0] sm:$0xff]  ;;  %v475_v1 = vld [vmem:[%s609_s0 + $0x8] sm:$0xff]  ;;  %s453_s0 = smov 112   ;;  %v456_v30 = vmov 0.0   ;;  %vm113_vm15 = vcmask 130048  }
   0x2   :  { %v33_v2 = vsel %vm32_vm0, %v470_v0, 0.0  ;;  %v40_v3 = vsel %vm32_vm0, %v475_v1, 0.0  ;;  %v11_v29 = vand.u32 127, %v10_v28  ;;  %v104_v54 = vshrl.u32 %v10_v28, 7 }
   0x3   :  { %v34_v4 = vrot.slane %v33_v2, 4  ;;  %v41_v5 = vrot.slane %v40_v3, 4 }
   0x4   :  { %vm17_vm3 = vcmp.ge.s32.totalorder %v11_v29, 16  ;;  %vm18_vm4 = vcmp.lt.s32.totalorder %v11_v29, 32  ;;  %vm13_vm6 = vcmp.lt.s32.totalorder %v11_v29, 16  ;;  %vm22_vm7 = vcmp.ge.s32.totalorder %v11_v29, 32 }
   0x5   :  { %v35_v6 = vadd.f32 %v34_v4, %v33_v2  ;;  %v42_v7 = vadd.f32 %v41_v5, %v40_v3  ;;  %vm19_vm5 = vmand %vm17_vm3, %vm18_vm4  ;;  %vm23_vm8 = vcmp.lt.s32.totalorder %v11_v29, 48  ;;  %vm27_vm9 = vcmp.ge.s32.totalorder %v11_v29, 48 }
   0x6   :  { %vm28_vm10 = vcmp.lt.s32.totalorder %v11_v29, 64  ;;  %v497_v31 = vsel %vm19_vm5, 1.0, %v456_v30  ;;  %v499_v32 = vsel %vm13_vm6, 1.0, %v456_v30  ;;  %vm24_vm11 = vmand %vm22_vm7, %vm23_vm8  ;;  %v509_v57 = vsub.s32 0, %v104_v54 }
   0x7   :  { %v36_v8 = vrot.slane %v35_v6, 2  ;;  %v43_v9 = vrot.slane %v42_v7, 2  ;;  %vm29_vm12 = vmand %vm27_vm9, %vm28_vm10  ;;  %v503_v37 = vsel %vm24_vm11, 1.0, %v456_v30  ;;  %vm407_vm5 = vcmask 517120  }
   0x8   :  { %v505_v38 = vsel %vm29_vm12, 1.0, %v456_v30 }
   0x9   :  { %v37_v10 = vadd.f32 %v36_v8, %v35_v6  ;;  %v44_v11 = vadd.f32 %v43_v9, %v42_v7 }
   0xb   :  { %v38_v12 = vrot.slane %v37_v10, 1  ;;  %v45_v13 = vrot.slane %v44_v11, 1 }
   0xd   :  { %v39_v14 = vadd.f32 %v38_v12, %v37_v10  ;;  %v46_v15 = vadd.f32 %v45_v13, %v44_v11 }
   0xf   :  { %v481_v16 = vmul.f32 0.5, %v39_v14  ;;  %v483_v17 = vmul.f32 0.5, %v46_v15 }
  0x11   :  { %v49_v18 = vmul.f32 %v481_v16, %v481_v16  ;;  %v50_v19 = vmul.f32 %v483_v17, %v483_v17 }
  0x13   :  { %v54_v20 = vsel %vm53_vm1, %v50_v19, %v49_v18 }
  0x14   :  { %61 = vrot.lane.b32.xlu0 %v54_v20, %s453_s0  ;;  %77 = vrot.lane.b32.xlu1 %v54_v20, %s454_s10  ;;  %v57_v21 = vsel %vm56_vm2, %v54_v20, 0.0 }
  0x18   :  { %69 = vrot.lane.b32.xlu0 %v54_v20, %s455_s11 }
  0x38   :  { %58 = vadd.xlane.f32.xlu1 %v57_v21 }
  0x86   :  { %v62_v22 = vpop.permute.xlu0 %61  ;;  %v78_v23 = vpop.permute.xlu1 %77 }
  0x87   :  { %v64_v24 = vsel %vm56_vm2, %v62_v22, 0.0  ;;  %v80_v25 = vsel %vm56_vm2, %v78_v23, 0.0 }
  0x88   :  { %65 = vadd.xlane.f32.xlu0 %v64_v24  ;;  %81 = vadd.xlane.f32.xlu1 %v80_v25 }
  0x8a   :  { %v70_v26 = vpop.permute.xlu0 %69 }
  0x8b   :  { %v72_v27 = vsel %vm56_vm2, %v70_v26, 0.0 }
  0x8c   :  { %73 = vadd.xlane.f32.xlu0 %v72_v27 }
  0xc1   :  { %v59_v33 = vpop.xlane.xlu1 %58 }
  0xc2   :  { %v60_v36 = vmul.f32 %v499_v32, %v59_v33 }
 0x111   :  { %v66_v34 = vpop.xlane.xlu0 %65  ;;  %v82_v39 = vpop.xlane.xlu1 %81 }
 0x112   :  { %v67_v35 = vmul.f32 %v497_v31, %v66_v34  ;;  %v83_v43 = vmul.f32 %v505_v38, %v82_v39 }
 0x114   :  { %v68_v41 = vadd.f32 %v67_v35, %v60_v36 }
 0x115   :  { %v74_v40 = vpop.xlane.xlu0 %73 }
 0x116   :  { %v75_v42 = vmul.f32 %v503_v37, %v74_v40 }
 0x118   :  { %v76_v44 = vadd.f32 %v75_v42, %v68_v41 }
 0x11a   :  { %v84_v45 = vadd.f32 %v83_v43, %v76_v44 }
 0x11c   :  { %425 = vrsqrt.f32 %v84_v45  ;;  %vm87_vm13 = vcmp.eq.f32.partialorder %v84_v45, inf  ;;  %v90_v48 = vand.u32 2147483648, %v84_v45  ;;  %vm89_vm14 = vcmp.eq.f32.partialorder %v84_v45, 0.0 }
 0x11d   :  { %v92_v51 = vadd.f32 1.0, %v84_v45 }
 0x129   :  { %v426_v46 = vpop.eup %425 }
 0x12a   :  { %v86_v47 = vmul.f32 %v426_v46, %v84_v45 }
 0x12c   :  { %v88_v49 = vsel %vm87_vm13, %v84_v45, %v86_v47 }
 0x12d   :  { %v91_v50 = vsel %vm89_vm14, %v90_v48, %v88_v49 }
 0x12e   :  { %v93_v52 = vadd.f32 1e-08, %v91_v50 }
 0x130   :  { %v94_v53 = vmul.f32 %v93_v52, %v92_v51 }
 0x132   :  { %427 = vrcp.f32 %v94_v53 }
 0x13f   :  { %v428_v55 = vpop.eup %427 }
 0x140   :  { %v96_v56 = vmul.f32 %v428_v55, %v84_v45 }
 0x142   :  { %v101_v58 = vmul.f32 %v96_v56, %v481_v16  ;;  %v98_v59 = vrot.slane %v96_v56, 1 }
 0x144   :  { %v106_v60 = vrot.slane %v101_v58, %v509_v57  ;;  %v102_v61 = vmul.f32 %v98_v59, %v483_v17 }
 0x146   :  { %v111_v62 = vmul.f32 %v106_v60, %v470_v0  ;;  %v110_v63 = vrot.slane %v102_v61, %v509_v57 }
 0x148   :  { %140 = vrot.lane.b32.xlu1 %v111_v62, %s455_s11  ;;  %124 = vrot.lane.b32.xlu0 %v111_v62, %s453_s0  ;;  %v112_v2 = vmul.f32 %v110_v63, %v475_v1  ;;  %v114_v4 = vsel %vm113_vm15, %v111_v62, 0.0 }
 0x14a   :  { %v117_v3 = vsel %vm113_vm15, %v112_v2, 0.0 }
 0x14c   :  { %142 = vrot.lane.b32.xlu0 %v112_v2, %s455_s11  ;;  %126 = vrot.lane.b32.xlu1 %v112_v2, %s453_s0 }
 0x150   :  { %158 = vrot.lane.b32.xlu0 %v112_v2, %s454_s10  ;;  %156 = vrot.lane.b32.xlu1 %v111_v62, %s454_s10 }
 0x16f   :  { %118 = vadd.xlane.f32.xlu0 %v117_v3 }
 0x174   :  { %115 = vadd.xlane.f32.xlu1 %v114_v4 }
 0x1ba   :  { %v141_v5 = vpop.permute.xlu1 %140  ;;  %v125_v6 = vpop.permute.xlu0 %124 }
 0x1bb   :  { %v130_v7 = vsel %vm113_vm15, %v125_v6, 0.0  ;;  %v146_v11 = vsel %vm113_vm15, %v141_v5, 0.0 }
 0x1bc   :  { %131 = vadd.xlane.f32.xlu0 %v130_v7 }
 0x1be   :  { %v143_v8 = vpop.permute.xlu0 %142  ;;  %v127_v9 = vpop.permute.xlu1 %126 }
 0x1bf   :  { %v133_v10 = vsel %vm113_vm15, %v127_v9, 0.0  ;;  %v149_v13 = vsel %vm113_vm15, %v143_v8, 0.0 }
 0x1c0   :  { %134 = vadd.xlane.f32.xlu1 %v133_v10  ;;  %147 = vadd.xlane.f32.xlu0 %v146_v11 }
 0x1c2   :  { %v157_v12 = vpop.permute.xlu1 %156  ;;  %v159_v15 = vpop.permute.xlu0 %158 }
 0x1c3   :  { %v162_v14 = vsel %vm113_vm15, %v157_v12, 0.0  ;;  %v165_v16 = vsel %vm113_vm15, %v159_v15, 0.0 }
 0x1c4   :  { %150 = vadd.xlane.f32.xlu1 %v149_v13  ;;  %163 = vadd.xlane.f32.xlu0 %v162_v14 }
 0x1c8   :  { %166 = vadd.xlane.f32.xlu1 %v165_v16 }
 0x1f8   :  { %v119_v17 = vpop.xlane.xlu0 %118 }
 0x1f9   :  { %v121_v29 = vmul.f32 %v499_v32, %v119_v17 }
 0x1fd   :  { %v116_v18 = vpop.xlane.xlu1 %115 }
 0x1fe   :  { %v120_v23 = vmul.f32 %v499_v32, %v116_v18 }
 0x245   :  { %v132_v19 = vpop.xlane.xlu0 %131 }
 0x246   :  { %v136_v20 = vmul.f32 %v497_v31, %v132_v19 }
 0x248   :  { %v138_v25 = vadd.f32 %v136_v20, %v120_v23 }
 0x249   :  { %v135_v21 = vpop.xlane.xlu1 %134  ;;  %v148_v22 = vpop.xlane.xlu0 %147 }
 0x24a   :  { %v152_v24 = vmul.f32 %v503_v37, %v148_v22  ;;  %v137_v26 = vmul.f32 %v497_v31, %v135_v21 }
 0x24c   :  { %v154_v30 = vadd.f32 %v152_v24, %v138_v25  ;;  %v139_v35 = vadd.f32 %v137_v26, %v121_v29 }
 0x24d   :  { %v151_v27 = vpop.xlane.xlu1 %150  ;;  %v164_v28 = vpop.xlane.xlu0 %163 }
 0x24e   :  { %v153_v33 = vmul.f32 %v503_v37, %v151_v27  ;;  %v168_v34 = vmul.f32 %v505_v38, %v164_v28 }
 0x250   :  { %v538_v36 = vadd.f32 %v168_v34, %v154_v30  ;;  %v155_v40 = vadd.f32 %v153_v33, %v139_v35 }
 0x251   :  { %v167_v39 = vpop.xlane.xlu1 %166 }
 0x252   :  { %v417_v41 = vmul.f32 -1.442695, %v538_v36  ;;  %v169_v42 = vmul.f32 %v505_v38, %v167_v39 }
 0x254   :  { %429 = vpow2.f32 %v417_v41  ;;  %v542_v43 = vadd.f32 %v169_v42, %v155_v40 }
 0x256   :  { %v418_v44 = vmul.f32 -1.442695, %v542_v43 }
 0x258   :  { %431 = vpow2.f32 %v418_v44 }
 0x261   :  { %v430_v45 = vpop.eup %429 }
 0x262   :  { %v178_v46 = vadd.f32 1.0, %v430_v45 }
 0x264   :  { %433 = vrcp.f32 %v178_v46 }
 0x265   :  { %v432_v47 = vpop.eup %431 }
 0x266   :  { %v179_v48 = vadd.f32 1.0, %v432_v47 }
 0x268   :  { %435 = vrcp.f32 %v179_v48 }
 0x271   :  { %v434_v49 = vpop.eup %433 }
 0x272   :  { %v184_v50 = vmul.f32 %v434_v49, %v470_v0 }
 0x274   :  { %v186_v51 = vsel %vm32_vm0, %v184_v50, 0.0 }
 0x275   :  { %v436_v52 = vpop.eup %435  ;;  %v187_v53 = vrot.slane %v186_v51, 4 }
 0x276   :  { %v185_v54 = vmul.f32 %v436_v52, %v475_v1 }
 0x277   :  { %v188_v55 = vadd.f32 %v187_v53, %v186_v51 }
 0x278   :  { %v193_v56 = vsel %vm32_vm0, %v185_v54, 0.0 }
 0x279   :  { %v189_v58 = vrot.slane %v188_v55, 2  ;;  %v194_v59 = vrot.slane %v193_v56, 4 }
 0x27b   :  { %v190_v60 = vadd.f32 %v189_v58, %v188_v55  ;;  %v195_v61 = vadd.f32 %v194_v59, %v193_v56 }
 0x27d   :  { %v191_v62 = vrot.slane %v190_v60, 1  ;;  %v196_v63 = vrot.slane %v195_v61, 2 }
 0x27f   :  { %v197_v2 = vadd.f32 %v196_v63, %v195_v61  ;;  %v192_v3 = vadd.f32 %v191_v62, %v190_v60 }
 0x281   :  { %v198_v4 = vrot.slane %v197_v2, 1  ;;  %v200_v6 = vmul.f32 %v192_v3, %v192_v3 }
 0x283   :  { %v199_v5 = vadd.f32 %v198_v4, %v197_v2 }
 0x285   :  { %v201_v7 = vmul.f32 %v199_v5, %v199_v5 }
 0x287   :  { %v204_v8 = vsel %vm53_vm1, %v201_v7, %v200_v6 }
 0x288   :  { %218 = vrot.lane.b32.xlu1 %v204_v8, %s455_s11  ;;  %210 = vrot.lane.b32.xlu0 %v204_v8, %s453_s0  ;;  %v206_v9 = vsel %vm56_vm2, %v204_v8, 0.0 }
 0x28c   :  { %226 = vrot.lane.b32.xlu1 %v204_v8, %s454_s10 }
 0x2a7   :  { %207 = vadd.xlane.f32.xlu0 %v206_v9 }
 0x2fa   :  { %v219_v10 = vpop.permute.xlu1 %218  ;;  %v211_v11 = vpop.permute.xlu0 %210 }
 0x2fb   :  { %v213_v12 = vsel %vm56_vm2, %v211_v11, 0.0  ;;  %v221_v13 = vsel %vm56_vm2, %v219_v10, 0.0 }
 0x2fc   :  { %214 = vadd.xlane.f32.xlu1 %v213_v12  ;;  %222 = vadd.xlane.f32.xlu0 %v221_v13 }
 0x2fe   :  { %v227_v14 = vpop.permute.xlu1 %226 }
 0x2ff   :  { %v229_v15 = vsel %vm56_vm2, %v227_v14, 0.0 }
 0x300   :  { %230 = vadd.xlane.f32.xlu0 %v229_v15 }
 0x330   :  { %v208_v16 = vpop.xlane.xlu0 %207 }
 0x331   :  { %v209_v19 = vmul.f32 %v499_v32, %v208_v16 }
 0x385   :  { %v215_v17 = vpop.xlane.xlu1 %214  ;;  %v223_v18 = vpop.xlane.xlu0 %222 }
 0x386   :  { %v216_v20 = vmul.f32 %v497_v31, %v215_v17  ;;  %v224_v22 = vmul.f32 %v503_v37, %v223_v18 }
 0x388   :  { %v217_v21 = vadd.f32 %v216_v20, %v209_v19 }
 0x389   :  { %v231_v23 = vpop.xlane.xlu0 %230 }
 0x38a   :  { %v225_v24 = vadd.f32 %v224_v22, %v217_v21  ;;  %v232_v25 = vmul.f32 %v505_v38, %v231_v23 }
 0x38c   :  { %v233_v26 = vadd.f32 %v232_v25, %v225_v24 }
 0x38e   :  { %437 = vrsqrt.f32 %v233_v26  ;;  %vm236_vm3 = vcmp.eq.f32.partialorder %v233_v26, inf  ;;  %v239_v29 = vand.u32 2147483648, %v233_v26  ;;  %vm238_vm4 = vcmp.eq.f32.partialorder %v233_v26, 0.0 }
 0x38f   :  { %v241_v34 = vadd.f32 1.0, %v233_v26 }
 0x39b   :  { %v438_v27 = vpop.eup %437 }
 0x39c   :  { %v235_v28 = vmul.f32 %v438_v27, %v233_v26 }
 0x39e   :  { %v237_v30 = vsel %vm236_vm3, %v233_v26, %v235_v28 }
 0x39f   :  { %v240_v33 = vsel %vm238_vm4, %v239_v29, %v237_v30 }
 0x3a0   :  { %v242_v35 = vadd.f32 1e-08, %v240_v33 }
 0x3a2   :  { %v243_v39 = vmul.f32 %v242_v35, %v241_v34 }
 0x3a4   :  { %439 = vrcp.f32 %v243_v39 }
 0x3b1   :  { %v440_v40 = vpop.eup %439 }
 0x3b2   :  { %v245_v41 = vmul.f32 %v440_v40, %v233_v26 }
 0x3b4   :  { %v250_v42 = vmul.f32 %v245_v41, %v192_v3  ;;  %v247_v44 = vrot.slane %v245_v41, 1 }
 0x3b6   :  { %v255_v45 = vrot.slane %v250_v42, %v509_v57  ;;  %v251_v46 = vmul.f32 %v247_v44, %v199_v5 }
 0x3b8   :  { %v260_v47 = vmul.f32 %v255_v45, %v470_v0  ;;  %v259_v48 = vrot.slane %v251_v46, %v509_v57 }
 0x3ba   :  { %272 = vrot.lane.b32.xlu1 %v260_v47, %s453_s0  ;;  %v261_v49 = vmul.f32 %v259_v48, %v475_v1  ;;  %v262_v50 = vsel %vm113_vm15, %v260_v47, 0.0 }
 0x3bc   :  { %274 = vrot.lane.b32.xlu0 %v261_v49, %s453_s0  ;;  %v265_v51 = vsel %vm113_vm15, %v261_v49, 0.0 }
 0x3be   :  { %288 = vrot.lane.b32.xlu1 %v260_v47, %s455_s11 }
 0x3c0   :  { %304 = vrot.lane.b32.xlu0 %v260_v47, %s454_s10 }
 0x3c2   :  { %290 = vrot.lane.b32.xlu1 %v261_v49, %s455_s11 }
 0x3c6   :  { %306 = vrot.lane.b32.xlu1 %v261_v49, %s454_s10 }
 0x3df   :  { %263 = vadd.xlane.f32.xlu0 %v262_v50 }
 0x3ea   :  { %266 = vadd.xlane.f32.xlu1 %v265_v51 }
 0x42c   :  { %v273_v57 = vpop.permute.xlu1 %272 }
 0x42d   :  { %v278_v52 = vsel %vm113_vm15, %v273_v57, 0.0 }
 0x42e   :  { %279 = vadd.xlane.f32.xlu0 %v278_v52  ;;  %v275_v53 = vpop.permute.xlu0 %274 }
 0x42f   :  { %v281_v55 = vsel %vm113_vm15, %v275_v53, 0.0 }
 0x430   :  { %v289_v54 = vpop.permute.xlu1 %288 }
 0x431   :  { %v294_v56 = vsel %vm113_vm15, %v289_v54, 0.0 }
 0x432   :  { %282 = vadd.xlane.f32.xlu0 %v281_v55  ;;  %v305_v58 = vpop.permute.xlu0 %304  ;;  %295 = vadd.xlane.f32.xlu1 %v294_v56 }
 0x433   :  { %v310_v61 = vsel %vm113_vm15, %v305_v58, 0.0 }
 0x434   :  { %v291_v59 = vpop.permute.xlu1 %290 }
 0x435   :  { %v297_v60 = vsel %vm113_vm15, %v291_v59, 0.0 }
 0x436   :  { %298 = vadd.xlane.f32.xlu0 %v297_v60  ;;  %311 = vadd.xlane.f32.xlu1 %v310_v61 }
 0x438   :  { %v307_v62 = vpop.permute.xlu1 %306 }
 0x439   :  { %v313_v63 = vsel %vm113_vm15, %v307_v62, 0.0 }
 0x43a   :  { %314 = vadd.xlane.f32.xlu0 %v313_v63 }
 0x468   :  { %v264_v2 = vpop.xlane.xlu0 %263 }
 0x469   :  { %v268_v8 = vmul.f32 %v499_v32, %v264_v2 }
 0x473   :  { %v267_v3 = vpop.xlane.xlu1 %266 }
 0x474   :  { %v269_v14 = vmul.f32 %v499_v32, %v267_v3 }
 0x4b7   :  { %v280_v4 = vpop.xlane.xlu0 %279 }
 0x4b8   :  { %v284_v5 = vmul.f32 %v497_v31, %v280_v4 }
 0x4ba   :  { %v286_v10 = vadd.f32 %v284_v5, %v268_v8 }
 0x4bb   :  { %v283_v6 = vpop.xlane.xlu0 %282  ;;  %v296_v7 = vpop.xlane.xlu1 %295 }
 0x4bc   :  { %v300_v9 = vmul.f32 %v503_v37, %v296_v7  ;;  %v285_v11 = vmul.f32 %v497_v31, %v283_v6 }
 0x4be   :  { %v302_v15 = vadd.f32 %v300_v9, %v286_v10  ;;  %v287_v18 = vadd.f32 %v285_v11, %v269_v14 }
 0x4bf   :  { %v299_v12 = vpop.xlane.xlu0 %298  ;;  %v312_v13 = vpop.xlane.xlu1 %311 }
 0x4c0   :  { %v301_v16 = vmul.f32 %v503_v37, %v299_v12  ;;  %v316_v17 = vmul.f32 %v505_v38, %v312_v13 }
 0x4c2   :  { %v318_v19 = vadd.f32 %v316_v17, %v302_v15  ;;  %v303_v21 = vadd.f32 %v301_v16, %v287_v18 }
 0x4c3   :  { %v315_v20 = vpop.xlane.xlu0 %314 }
 0x4c4   :  { %v320_v22 = vadd.f32 %v318_v19, %v538_v36  ;;  %v317_v23 = vmul.f32 %v505_v38, %v315_v20 }
 0x4c6   :  { %v419_v24 = vmul.f32 -1.442695, %v320_v22  ;;  %v319_v25 = vadd.f32 %v317_v23, %v303_v21 }
 0x4c8   :  { %441 = vpow2.f32 %v419_v24  ;;  %v321_v26 = vadd.f32 %v319_v25, %v542_v43 }
 0x4ca   :  { %v420_v27 = vmul.f32 -1.442695, %v321_v26 }
 0x4cc   :  { %443 = vpow2.f32 %v420_v27 }
 0x4d5   :  { %v442_v28 = vpop.eup %441 }
 0x4d6   :  { %v328_v29 = vadd.f32 1.0, %v442_v28 }
 0x4d8   :  { %445 = vrcp.f32 %v328_v29 }
 0x4d9   :  { %v444_v30 = vpop.eup %443 }
 0x4da   :  { %v329_v33 = vadd.f32 1.0, %v444_v30 }
 0x4dc   :  { %447 = vrcp.f32 %v329_v33 }
 0x4e5   :  { %v446_v34 = vpop.eup %445 }
 0x4e6   :  { %v334_v35 = vmul.f32 %v446_v34, %v470_v0 }
 0x4e8   :  { %v336_v36 = vsel %vm32_vm0, %v334_v35, 0.0 }
 0x4e9   :  { %v448_v39 = vpop.eup %447  ;;  %v337_v40 = vrot.slane %v336_v36, 4 }
 0x4ea   :  { %v335_v41 = vmul.f32 %v448_v39, %v475_v1 }
 0x4eb   :  { %v338_v42 = vadd.f32 %v337_v40, %v336_v36 }
 0x4ec   :  { %v343_v43 = vsel %vm32_vm0, %v335_v41, 0.0 }
 0x4ed   :  { %v339_v44 = vrot.slane %v338_v42, 2  ;;  %v344_v45 = vrot.slane %v343_v43, 4 }
 0x4ef   :  { %v340_v46 = vadd.f32 %v339_v44, %v338_v42  ;;  %v345_v47 = vadd.f32 %v344_v45, %v343_v43 }
 0x4f1   :  { %v341_v48 = vrot.slane %v340_v46, 1  ;;  %v346_v49 = vrot.slane %v345_v47, 2 }
 0x4f3   :  { %v347_v50 = vadd.f32 %v346_v49, %v345_v47  ;;  %v342_v51 = vadd.f32 %v341_v48, %v340_v46 }
 0x4f5   :  { %v348_v57 = vrot.slane %v347_v50, 1  ;;  %v350_v0 = vmul.f32 %v342_v51, %v342_v51 }
 0x4f7   :  { %v349_v52 = vadd.f32 %v348_v57, %v347_v50 }
 0x4f9   :  { %v351_v53 = vmul.f32 %v349_v52, %v349_v52 }
 0x4fb   :  { %v354_v54 = vsel %vm53_vm1, %v351_v53, %v350_v0 }
 0x4fc   :  { %368 = vrot.lane.b32.xlu1 %v354_v54, %s455_s11  ;;  %360 = vrot.lane.b32.xlu0 %v354_v54, %s453_s0  ;;  %v356_v1 = vsel %vm56_vm2, %v354_v54, 0.0 }
 0x520   :  { %357 = vadd.xlane.f32.xlu1 %v356_v1 }
 0x56e   :  { %v369_v55 = vpop.permute.xlu1 %368  ;;  %v361_v56 = vpop.permute.xlu0 %360 }
 0x56f   :  { %v371_v58 = vsel %vm56_vm2, %v369_v55, 0.0  ;;  %v363_v59 = vsel %vm56_vm2, %v361_v56, 0.0 }
 0x570   :  { %372 = vadd.xlane.f32.xlu0 %v371_v58  ;;  %364 = vadd.xlane.f32.xlu1 %v363_v59 }
 0x581   :  { %376 = vrot.lane.b32.xlu1 %v354_v54, %s454_s10 }
 0x5a9   :  { %v358_v60 = vpop.xlane.xlu1 %357 }
 0x5aa   :  { %v359_v3 = vmul.f32 %v499_v32, %v358_v60 }
 0x5f9   :  { %v365_v61 = vpop.xlane.xlu1 %364  ;;  %v373_v4 = vpop.xlane.xlu0 %372 }
 0x5fa   :  { %v366_v2 = vmul.f32 %v497_v31, %v365_v61  ;;  %v374_v6 = vmul.f32 %v503_v37, %v373_v4 }
 0x5fc   :  { %v367_v5 = vadd.f32 %v366_v2, %v359_v3 }
 0x5fd   :  { %v377_v62 = vpop.permute.xlu1 %376 }
 0x5fe   :  { %v379_v63 = vsel %vm56_vm2, %v377_v62, 0.0  ;;  %v375_v8 = vadd.f32 %v374_v6, %v367_v5 }
 0x5ff   :  { %380 = vadd.xlane.f32.xlu1 %v379_v63 }
 0x688   :  { %v381_v7 = vpop.xlane.xlu1 %380 }
 0x689   :  { %v382_v9 = vmul.f32 %v505_v38, %v381_v7 }
 0x68b   :  { %v383_v10 = vadd.f32 %v382_v9, %v375_v8 }
 0x68d   :  { %449 = vrsqrt.f32 %v383_v10  ;;  %vm386_vm0 = vcmp.eq.f32.partialorder %v383_v10, inf  ;;  %v389_v13 = vand.u32 2147483648, %v383_v10  ;;  %vm388_vm2 = vcmp.eq.f32.partialorder %v383_v10, 0.0 }
 0x68e   :  { %v391_v31 = vadd.f32 1.0, %v383_v10 }
 0x69a   :  { %v450_v11 = vpop.eup %449 }
 0x69b   :  { %v385_v12 = vmul.f32 %v450_v11, %v383_v10 }
 0x69d   :  { %v387_v14 = vsel %vm386_vm0, %v383_v10, %v385_v12 }
 0x69e   :  { %v390_v15 = vsel %vm388_vm2, %v389_v13, %v387_v14 }
 0x69f   :  { %v392_v16 = vadd.f32 1e-08, %v390_v15 }
 0x6a1   :  { %v393_v32 = vmul.f32 %v392_v16, %v391_v31 }
 0x6a3   :  { %451 = vrcp.f32 %v393_v32 }
 0x6b0   :  { %v452_v17 = vpop.eup %451 }
 0x6b1   :  { %v395_v18 = vmul.f32 %v452_v17, %v383_v10 }
 0x6b3   :  { %v397_v37 = vrot.slane %v395_v18, 1  ;;  %v400_v20 = vmul.f32 %v395_v18, %v342_v51 }
 0x6b5   :  { %v401_v19 = vmul.f32 %v397_v37, %v349_v52 }
 0x6b7   :  { %v404_v38 = vrot.slane %v401_v19, 7 }
 0x6b9   :  { %v405_v21 = vsel %vm53_vm1, %v404_v38, %v400_v20 }
 0x6ba   :  { %408 = vst.msk [vmem:[%s610_s1] sm:$0x3] %vm407_vm5, %v405_v21 }

</bundles_post_ra>
